<compile_context>
chip_gen: v5e
topology: v5e:2x2
jax: 0.10.0
libtpu: 0.0.40
codegen_flags: <defaults>
</compile_context>

<pallas_src>
import jax
import jax.numpy as jnp
from jax.experimental import pallas as pl
from jax.experimental.pallas import tpu as pltpu

_LANE = 128
_TARGET_BLOCK_BYTES = 2 * 1024 * 1024  # ~2 MiB per block: safe on v5e/v6e/v7x


def _sublane(dtype) -> int:
    """Native sublane packing for the dtype: 8 for 4-byte, 16 for 2-byte, 32 for 1-byte."""
    itemsize = jnp.dtype(dtype).itemsize
    return {4: 8, 2: 16, 1: 32}.get(itemsize, 8)


def _add10_kernel(x_ref, o_ref):
    # dtype-matched constant -> no silent promotion of integer inputs.
    o_ref[...] = x_ref[...] + jnp.asarray(10, dtype=x_ref.dtype)


def _run_add10_2d(x2):
    """Run the Pallas kernel on a 2-D slab whose dims are tile-aligned."""
    rows, cols = x2.shape
    itemsize = jnp.dtype(x2.dtype).itemsize
    sub = _sublane(x2.dtype)

    # Size the block by bytes (~2 MiB), rounded down to the dtype's sublane tile.
    tile_r = max(_TARGET_BLOCK_BYTES // (cols * itemsize), sub)
    tile_r = (tile_r // sub) * sub
    tile_r = min(tile_r, rows)
    grid = (pl.cdiv(rows, tile_r),)

    # NOTE: input_output_aliases={0: 0} would also work here if the caller
    # donates x; skipped so the wrapper stays safe for non-donated inputs.
    return pl.pallas_call(
        _add10_kernel,
        out_shape=jax.ShapeDtypeStruct((rows, cols), x2.dtype),
        grid_spec=pltpu.PrefetchScalarGridSpec(
            num_scalar_prefetch=0,
            grid=grid,
            in_specs=[pl.BlockSpec((tile_r, cols), lambda i: (i, 0))],
            out_specs=pl.BlockSpec((tile_r, cols), lambda i: (i, 0)),
        ),
        compiler_params=pltpu.CompilerParams(
            dimension_semantics=("parallel",),
        ),
    )(x2)


def add10(x):
    """Computes x + 10 elementwise with a Pallas TPU kernel (layout preserved)."""
    orig_shape = x.shape
    total = int(x.size)
    if total == 0:
        return x

    sub = _sublane(x.dtype)
    min_tile = sub * _LANE  # one full packed (sublane, lane) tile in elements

    flat = x.reshape(total)

    if total % min_tile == 0:
        # Common path: no pad, no slice. Reshape the flat tensor into a
        # lane-dense slab (cols = 128*k, k | q) so rows stays a multiple of
        # the sublane packing and every store is a full, unmasked vst.
        q = total // min_tile
        k = 1
        for cand in range(min(q, 16), 0, -1):  # cols capped at 2048 lanes
            if q % cand == 0:
                k = cand
                break
        cols = _LANE * k
        rows = total // cols
        out2 = _run_add10_2d(flat.reshape(rows, cols))
        return out2.reshape(orig_shape)

    # Ragged total: pad the flat vector once to a full packed tile, run the
    # same kernel, then slice back. Only taken for awkward element counts.
    padded = ((total + min_tile - 1) // min_tile) * min_tile
    flat_p = jnp.pad(flat, (0, padded - total))
    out2 = _run_add10_2d(flat_p.reshape(padded // _LANE, _LANE))
    return out2.reshape(-1)[:total].reshape(orig_shape)


class MyModuleJax:
    """JAX counterpart of the PyTorch MyModule.

    Both branches of the PyTorch module compute x + 10 (the memory_efficient
    branch only adds a pdb breakpoint), so a single kernel suffices.
    """

    def __init__(self, use_memory_efficient: bool):
        self.use_memory_efficient = use_memory_efficient
        self._fn = jax.jit(add10)

    def __call__(self, x):
        return self._fn(x)


if __name__ == "__main__":
    key = jax.random.PRNGKey(0)
    # Small NCHW-like input consistent with the module's generic forward.
    x = jax.random.normal(key, (2, 4, 16, 16), dtype=jnp.float32)

    module = MyModuleJax(use_memory_efficient=False)
    out = module(x)
    out = jax.block_until_ready(out)

    # Correctness check against the reference semantics (x + 10).
    ref = x + 10.0
    assert out.shape == x.shape and out.dtype == x.dtype
    assert jnp.max(jnp.abs(out - ref)) < 1e-6

    # Also sanity-check an integer input stays integer (torch `x + 10` semantics).
    xi = jnp.arange(2 * 4 * 16 * 16, dtype=jnp.int32).reshape(2, 4, 16, 16)
    outi = jax.block_until_ready(module(xi))
    assert outi.dtype == jnp.int32
    assert jnp.all(outi == xi + 10)

    print("KERNEL_OK")
</pallas_src>

<mosaic_0001>
module attributes {stable_mosaic.version = 11 : i64} {
  func.func @_add10_kernel(%arg0: i32, %arg1: memref<8x256xf32, #tpu.memory_space<vmem>>, %arg2: memref<8x256xf32, #tpu.memory_space<vmem>>) attributes {dimension_semantics = [#tpu.dimension_semantics<parallel>], iteration_bounds = array<i64: 1>, scalar_prefetch = 0 : i64, scratch_operands = 0 : i64, tpu.core_type = #tpu.core_type<tc>, window_params = [{transform_indices = @transform_0, window_bounds = array<i64: 8, 256>}, {transform_indices = @transform_1, window_bounds = array<i64: 8, 256>}]} {
    %c0 = arith.constant 0 : index
    %c0_0 = arith.constant 0 : index
    %0 = vector.load %arg1[%c0, %c0_0] : memref<8x256xf32, #tpu.memory_space<vmem>>, vector<8x256xf32>
    %cst = arith.constant 1.000000e+01 : f32
    %1 = vector.broadcast %cst : f32 to vector<8x256xf32>
    %2 = arith.addf %0, %1 : vector<8x256xf32>
    %c0_1 = arith.constant 0 : index
    %c0_2 = arith.constant 0 : index
    %3 = vector.load %arg2[%c0_1, %c0_2] : memref<8x256xf32, #tpu.memory_space<vmem>>, vector<8x256xf32>
    tpu.vector_store %arg2[%c0_1, %c0_2], %2 {strides = array<i32>} : memref<8x256xf32, #tpu.memory_space<vmem>>, vector<8x256xf32>,
    return
  }
  func.func @transform_0(%arg0: i32) -> (i32, i32) {
    %c0_i32 = arith.constant 0 : i32
    %c0_i32_0 = arith.constant 0 : i32
    return %arg0, %c0_i32 : i32, i32
  }
  func.func @transform_1(%arg0: i32) -> (i32, i32) {
    %c0_i32 = arith.constant 0 : i32
    %c0_i32_0 = arith.constant 0 : i32
    return %arg0, %c0_i32 : i32, i32
  }
}

</mosaic_0001>

<bundles_post_ra>
// kernel: add10.1
= control target key start
LH: loop header
LB: loop body
LE: loop exit
PB: predicated region body
PF: predicated region fallthrough
CT: control target
= control target key end

     0   :  { %s40_s0 = inlined_call_operand.vmem [shape: f32[8,256], index: 0, kind: input, shape index: {}]   ;;  %s41_s1 = inlined_call_operand.vmem [shape: f32[8,256], index: 1, kind: output, shape index: {}]  }
   0x1   :  { %v8_v0 = vld [vmem:[%s40_s0] sm:$0xff]  ;;  %v9_v1 = vld [vmem:[%s40_s0 + $0x8] sm:$0xff] }
   0x2   :  { %v10_v2 = vadd.f32 10.0, %v8_v0  ;;  %v11_v3 = vadd.f32 10.0, %v9_v1 }
   0x4   :  { %12 = vst [vmem:[%s41_s1] sm:$0xff] %v10_v2 }
   0x5   :  { %13 = vst [vmem:[%s41_s1 + $0x8] sm:$0xff] %v11_v3 }

</bundles_post_ra>
